<compile_context>
chip_gen: v5e
topology: v5e:2x2
jax: 0.10.0
libtpu: 0.0.40
codegen_flags: <defaults>
</compile_context>

<pallas_src>
import functools

import jax
import jax.numpy as jnp
from jax.experimental import pallas as pl
from jax.experimental.pallas import tpu as pltpu


def _ms_apr_head_kernel(feat_ref, w1_ref, b1_ref, wh_ref, bh_ref, out_ref, *,
                        inv_hw, n_scenes):
    # feat block: (tile_b, C, HW), f32, native NCHW layout.
    feat = feat_ref[...]

    # ---- AdaptiveAvgPool2d(1) + flatten(start_dim=1): mean over spatial ----
    pooled = jnp.sum(feat, axis=-1) * inv_hw                    # (tile_b, C) f32
    # TODO(synk): at real EfficientNet sizes (HW=49, C=1280) route this reduce
    # through the MXU (ones-vector contraction) instead of the XLU/VPU.

    # ---- fc_after_fm + ReLU (bf16 MXU inputs, f32 accumulate) ----
    fm = jnp.dot(pooled.astype(jnp.bfloat16), w1_ref[...],
                 preferred_element_type=jnp.float32) + b1_ref[...]
    fm = jnp.maximum(fm, 0.0)                                   # (tile_b, D) f32
    # TODO(synk): nn.Dropout(p=0.1) is identity here (eval-mode semantics).

    # ---- fused scene_cls + scene_fc_layers + identity(fm) in one MXU pass ---
    # wh columns: [0:S)=scene_cls, [S:S+7)=pose, [S+7:S+7+D)=I_D, rest zero.
    head = jnp.dot(fm.astype(jnp.bfloat16), wh_ref[...],
                   preferred_element_type=jnp.float32) + bh_ref[...]

    # ---- log_softmax over the first n_scenes lanes only (iota mask) ----
    lane = jax.lax.broadcasted_iota(jnp.int32, head.shape, head.ndim - 1)
    is_logit = lane < n_scenes
    masked = jnp.where(is_logit, head, -jnp.inf)
    m = jnp.max(masked, axis=-1, keepdims=True)
    p = jnp.exp(masked - m)                                     # 0 on masked lanes
    lse = jnp.log(jnp.sum(p, axis=-1, keepdims=True)) + m

    # Single lane-dense (tile_b, OUT_W) store: logits->log-probs, rest as-is.
    out_ref[...] = jnp.where(is_logit, head - lse, head)


def _grid_steps(batch):
    """1 grid step on single-TC chips; 2 parallel steps on megacore chips."""
    kind = ""
    try:
        kind = jax.devices()[0].device_kind.lower()
    except Exception:
        pass
    two_tc = any(tag in kind for tag in ("v7", "v5p", "v4"))
    if two_tc and batch % 2 == 0 and (batch // 2) % 8 == 0:
        return 2
    return 1


def ms_apr_head(feat_nchw, params):
    """feat_nchw: (B, C, H, W) backbone feature map (native NCHW, f32)."""
    w1, b1 = params["w1"], params["b1"]
    wc, bc, wp, bp = params["wc"], params["bc"], params["wp"], params["bp"]

    B, C, H, W = feat_nchw.shape
    HW = H * W
    D = w1.shape[1]
    S = wc.shape[1]

    # Free, contiguous reshape only (no transpose, no cast, no extra HBM pass).
    feat = feat_nchw.reshape(B, C, HW)

    # Lane-dense fused head weight: [scene logits | pose | identity(fm) | pad].
    out_w = max(128, -(-(S + 7 + D) // 128) * 128)
    wh = jnp.zeros((D, out_w), jnp.float32)
    wh = wh.at[:, :S].set(wc)
    wh = wh.at[:, S:S + 7].set(wp)
    wh = wh.at[:, S + 7:S + 7 + D].set(jnp.eye(D, dtype=jnp.float32))
    bh = jnp.zeros((1, out_w), jnp.float32)
    bh = bh.at[:, :S].set(bc)
    bh = bh.at[:, S:S + 7].set(bp)

    # bf16 MXU operands (f32 accumulation inside the kernel); biases stay f32.
    w1_b = w1.astype(jnp.bfloat16)
    wh_b = wh.astype(jnp.bfloat16)

    n_steps = _grid_steps(B)
    tile_b = B // n_steps

    kernel = functools.partial(_ms_apr_head_kernel,
                               inv_hw=1.0 / float(HW), n_scenes=S)

    flops = B * HW * C + 2 * B * C * D + 2 * B * D * out_w
    bytes_accessed = (feat.size * 4 + (w1_b.size + wh_b.size) * 2
                      + (b1.size + bh.size) * 4 + B * out_w * 4)
    cost = pl.CostEstimate(flops=flops, transcendentals=B * (out_w + 1),
                           bytes_accessed=bytes_accessed)

    out = pl.pallas_call(
        kernel,
        out_shape=jax.ShapeDtypeStruct((B, out_w), jnp.float32),
        grid_spec=pltpu.PrefetchScalarGridSpec(
            num_scalar_prefetch=0,
            grid=(n_steps,),
            in_specs=[
                # feature map: tiled over batch (whole batch if n_steps == 1).
                pl.BlockSpec((tile_b, C, HW), lambda i: (i, 0, 0)),
                # weights / biases: constant block index -> stay resident.
                pl.BlockSpec((C, D), lambda i: (0, 0)),
                pl.BlockSpec((1, D), lambda i: (0, 0)),
                pl.BlockSpec((D, out_w), lambda i: (0, 0)),
                pl.BlockSpec((1, out_w), lambda i: (0, 0)),
            ],
            out_specs=pl.BlockSpec((tile_b, out_w), lambda i: (i, 0)),
        ),
        compiler_params=pltpu.CompilerParams(
            dimension_semantics=("parallel",),
        ),
        cost_estimate=cost,
    )(feat, w1_b, b1, wh_b, bh)

    # Unpack the fused lane-dense slab outside the kernel (cheap XLA slices).
    return {
        "sr_est_pose": out[:, S:S + 7],
        "est_scene_distr": out[:, :S],
        "feature": out[:, S + 7:S + 7 + D],
    }


def init_params(key, backbone_out, backbone_next_out, n_scenes):
    """Deterministic synthetic parameters (shapes match the nn.Linear layers).

    Weights: kaiming-normal (std = sqrt(2 / fan_in)), stored as (in, out).
    Biases : uniform(-1/sqrt(fan_in), 1/sqrt(fan_in)) like nn.Linear default.
    """
    ks = jax.random.split(key, 6)

    def kaiming(k, fan_in, fan_out):
        return (jax.random.normal(k, (fan_in, fan_out), jnp.float32)
                * jnp.sqrt(2.0 / fan_in))

    def bias(k, fan_in, fan_out):
        bound = 1.0 / jnp.sqrt(jnp.float32(fan_in))
        return jax.random.uniform(k, (1, fan_out), jnp.float32, -bound, bound)

    return {
        "w1": kaiming(ks[0], backbone_out, backbone_next_out),
        "b1": bias(ks[1], backbone_out, backbone_next_out),
        "wc": kaiming(ks[2], backbone_next_out, n_scenes),
        "bc": bias(ks[3], backbone_next_out, n_scenes),
        "wp": kaiming(ks[4], backbone_next_out, 7),
        "bp": bias(ks[5], backbone_next_out, 7),
    }


def _reference(feat_nchw, params):
    """Pure-JAX f32 reference of the head."""
    B, C, H, W = feat_nchw.shape
    pooled = jnp.mean(feat_nchw.reshape(B, C, H * W), axis=-1)
    fm = jnp.maximum(pooled @ params["w1"] + params["b1"], 0.0)
    logits = fm @ params["wc"] + params["bc"]
    distr = jax.nn.log_softmax(logits, axis=1)
    pose = fm @ params["wp"] + params["bp"]
    return {"sr_est_pose": pose, "est_scene_distr": distr, "feature": fm}


if __name__ == "__main__":
    # TODO(synk): EfficientNet-b0 backbone not implemented; the kernel consumes
    # a synthetic pre-extracted feature map instead of a raw image.
    B, C, H, W = 16, 32, 8, 8        # backbone_out_dim = 32
    D = 32                           # backbone_next_out = 32
    S = 4                            # num_scenes = 4

    key = jax.random.PRNGKey(0)
    k_feat, k_params = jax.random.split(key)
    feat = jax.random.normal(k_feat, (B, C, H, W), jnp.float32)
    params = init_params(k_params, C, D, S)

    out = ms_apr_head(feat, params)
    jax.block_until_ready(out)

    assert out["sr_est_pose"].shape == (B, 7)
    assert out["est_scene_distr"].shape == (B, S)
    assert out["feature"].shape == (B, D)
    # log_softmax rows should (exp-)sum to ~1
    assert jnp.allclose(
        jnp.sum(jnp.exp(out["est_scene_distr"]), axis=1), 1.0, atol=1e-4)

    ref = _reference(feat, params)
    for name in ("sr_est_pose", "est_scene_distr", "feature"):
        assert jnp.allclose(out[name], ref[name], atol=2e-2, rtol=2e-2), name

    print("KERNEL_OK")
</pallas_src>

<mosaic_0001>
module attributes {stable_mosaic.version = 11 : i64} {
  func.func @_ms_apr_head_kernel(%arg0: i32, %arg1: memref<16x32x64xf32, #tpu.memory_space<vmem>>, %arg2: memref<32x32xbf16, #tpu.memory_space<vmem>>, %arg3: memref<1x32xf32, #tpu.memory_space<vmem>>, %arg4: memref<32x128xbf16, #tpu.memory_space<vmem>>, %arg5: memref<1x128xf32, #tpu.memory_space<vmem>>, %arg6: memref<16x128xf32, #tpu.memory_space<vmem>>) attributes {dimension_semantics = [#tpu.dimension_semantics<parallel>], iteration_bounds = array<i64: 1>, scalar_prefetch = 0 : i64, scratch_operands = 0 : i64, tpu.core_type = #tpu.core_type<tc>, window_params = [{transform_indices = @transform_0, window_bounds = array<i64: 16, 32, 64>}, {pipeline_mode = #tpu.pipeline_mode<synchronous>, transform_indices = @transform_1, window_bounds = array<i64: 32, 32>}, {pipeline_mode = #tpu.pipeline_mode<synchronous>, transform_indices = @transform_2, window_bounds = array<i64: 1, 32>}, {pipeline_mode = #tpu.pipeline_mode<synchronous>, transform_indices = @transform_3, window_bounds = array<i64: 32, 128>}, {pipeline_mode = #tpu.pipeline_mode<synchronous>, transform_indices = @transform_4, window_bounds = array<i64: 1, 128>}, {transform_indices = @transform_5, window_bounds = array<i64: 16, 128>}]} {
    %c0 = arith.constant 0 : index
    %c0_0 = arith.constant 0 : index
    %c0_1 = arith.constant 0 : index
    %0 = vector.load %arg1[%c0, %c0_0, %c0_1] : memref<16x32x64xf32, #tpu.memory_space<vmem>>, vector<16x32x64xf32>
    %cst = arith.constant dense<0.000000e+00> : vector<16x32xf32>
    %1 = vector.multi_reduction <add>, %0, %cst [2] : vector<16x32x64xf32> to vector<16x32xf32>
    %cst_2 = arith.constant 1.562500e-02 : f32
    %2 = vector.broadcast %cst_2 : f32 to vector<16x32xf32>
    %3 = arith.mulf %1, %2 : vector<16x32xf32>
    %4 = arith.truncf %3 : vector<16x32xf32> to vector<16x32xbf16>
    %c0_3 = arith.constant 0 : index
    %c0_4 = arith.constant 0 : index
    %5 = vector.load %arg2[%c0_3, %c0_4] : memref<32x32xbf16, #tpu.memory_space<vmem>>, vector<32x32xbf16>
    %cst_5 = arith.constant dense<0.000000e+00> : vector<16x32xf32>
    %6 = tpu.matmul %4, %5, %cst_5 {dimension_numbers = #tpu.dot_dimension_numbers<[1], [0], [0], [1], [0, 0, 1, 1], [], []>} : vector<16x32xbf16>, vector<32x32xbf16>, vector<16x32xf32> -> vector<16x32xf32>
    %c0_6 = arith.constant 0 : index
    %c0_7 = arith.constant 0 : index
    %7 = vector.load %arg3[%c0_6, %c0_7] : memref<1x32xf32, #tpu.memory_space<vmem>>, vector<1x32xf32>
    %8 = vector.broadcast %7 : vector<1x32xf32> to vector<16x32xf32>
    %9 = arith.addf %6, %8 : vector<16x32xf32>
    %cst_8 = arith.constant 0.000000e+00 : f32
    %10 = vector.broadcast %cst_8 : f32 to vector<16x32xf32>
    %11 = arith.maximumf %9, %10 : vector<16x32xf32>
    %12 = arith.truncf %11 : vector<16x32xf32> to vector<16x32xbf16>
    %c0_9 = arith.constant 0 : index
    %c0_10 = arith.constant 0 : index
    %13 = vector.load %arg4[%c0_9, %c0_10] : memref<32x128xbf16, #tpu.memory_space<vmem>>, vector<32x128xbf16>
    %cst_11 = arith.constant dense<0.000000e+00> : vector<16x128xf32>
    %14 = tpu.matmul %12, %13, %cst_11 {dimension_numbers = #tpu.dot_dimension_numbers<[1], [0], [0], [1], [0, 0, 1, 1], [], []>} : vector<16x32xbf16>, vector<32x128xbf16>, vector<16x128xf32> -> vector<16x128xf32>
    %c0_12 = arith.constant 0 : index
    %c0_13 = arith.constant 0 : index
    %15 = vector.load %arg5[%c0_12, %c0_13] : memref<1x128xf32, #tpu.memory_space<vmem>>, vector<1x128xf32>
    %16 = vector.broadcast %15 : vector<1x128xf32> to vector<16x128xf32>
    %17 = arith.addf %14, %16 : vector<16x128xf32>
    %18 = tpu.iota {dimensions = array<i32: 1>} : vector<16x128xi32>
    %c4_i32 = arith.constant 4 : i32
    %19 = vector.broadcast %c4_i32 : i32 to vector<16x128xi32>
    %20 = arith.cmpi slt, %18, %19 : vector<16x128xi32>
    %cst_14 = arith.constant 0xFF800000 : f32
    %21 = vector.broadcast %cst_14 : f32 to vector<16x128xf32>
    %22 = arith.select %20, %17, %21 : vector<16x128xi1>, vector<16x128xf32>
    %cst_15 = arith.constant dense<0xFF800000> : vector<16xf32>
    %23 = vector.multi_reduction <maximumf>, %22, %cst_15 [1] : vector<16x128xf32> to vector<16xf32>
    %24 = vector.shape_cast %23 : vector<16xf32> to vector<16x1xf32>
    %25 = vector.broadcast %24 : vector<16x1xf32> to vector<16x128xf32>
    %26 = arith.subf %22, %25 : vector<16x128xf32>
    %27 = math.exp %26 : vector<16x128xf32>
    %cst_16 = arith.constant dense<0.000000e+00> : vector<16xf32>
    %28 = vector.multi_reduction <add>, %27, %cst_16 [1] : vector<16x128xf32> to vector<16xf32>
    %29 = vector.shape_cast %28 : vector<16xf32> to vector<16x1xf32>
    %30 = math.log %29 : vector<16x1xf32>
    %31 = arith.addf %30, %24 : vector<16x1xf32>
    %32 = vector.broadcast %31 : vector<16x1xf32> to vector<16x128xf32>
    %33 = arith.subf %17, %32 : vector<16x128xf32>
    %34 = arith.select %20, %33, %17 : vector<16x128xi1>, vector<16x128xf32>
    %c0_17 = arith.constant 0 : index
    %c0_18 = arith.constant 0 : index
    %35 = vector.load %arg6[%c0_17, %c0_18] : memref<16x128xf32, #tpu.memory_space<vmem>>, vector<16x128xf32>
    tpu.vector_store %arg6[%c0_17, %c0_18], %34 {strides = array<i32>} : memref<16x128xf32, #tpu.memory_space<vmem>>, vector<16x128xf32>,
    return
  }
  func.func @transform_0(%arg0: i32) -> (i32, i32, i32) {
    %c0_i32 = arith.constant 0 : i32
    %c0_i32_0 = arith.constant 0 : i32
    %c0_i32_1 = arith.constant 0 : i32
    return %arg0, %c0_i32, %c0_i32_0 : i32, i32, i32
  }
  func.func @transform_1(%arg0: i32) -> (i32, i32) {
    %c0_i32 = arith.constant 0 : i32
    %c0_i32_0 = arith.constant 0 : i32
    %c0_i32_1 = arith.constant 0 : i32
    return %c0_i32, %c0_i32_0 : i32, i32
  }
  func.func @transform_2(%arg0: i32) -> (i32, i32) {
    %c0_i32 = arith.constant 0 : i32
    %c0_i32_0 = arith.constant 0 : i32
    %c0_i32_1 = arith.constant 0 : i32
    return %c0_i32, %c0_i32_0 : i32, i32
  }
  func.func @transform_3(%arg0: i32) -> (i32, i32) {
    %c0_i32 = arith.constant 0 : i32
    %c0_i32_0 = arith.constant 0 : i32
    %c0_i32_1 = arith.constant 0 : i32
    return %c0_i32, %c0_i32_0 : i32, i32
  }
  func.func @transform_4(%arg0: i32) -> (i32, i32) {
    %c0_i32 = arith.constant 0 : i32
    %c0_i32_0 = arith.constant 0 : i32
    %c0_i32_1 = arith.constant 0 : i32
    return %c0_i32, %c0_i32_0 : i32, i32
  }
  func.func @transform_5(%arg0: i32) -> (i32, i32) {
    %c0_i32 = arith.constant 0 : i32
    %c0_i32_0 = arith.constant 0 : i32
    return %arg0, %c0_i32 : i32, i32
  }
}

</mosaic_0001>

<bundles_post_ra>
// kernel: tpu_custom_call.1
= control target key start
LH: loop header
LB: loop body
LE: loop exit
PB: predicated region body
PF: predicated region fallthrough
CT: control target
= control target key end

     0   :  { %10 = vsyncpa [#allocation3], 0  ;;  %s1216_s0 = inlined_call_operand.hbm [shape: f32[16,32,64], index: 0, kind: input, shape index: {}]   ;;  %s1217_s1 = inlined_call_operand.hbm [shape: bf16[32,32], index: 1, kind: input, shape index: {}]   ;;  %s1218_s2 = inlined_call_operand.vmem [shape: f32[1,32], index: 2, kind: input, shape index: {}]   ;;  %s1219_s3 = inlined_call_operand.hbm [shape: bf16[32,128], index: 3, kind: input, shape index: {}]   ;;  %s1220_s4 = inlined_call_operand.vmem [shape: f32[1,128], index: 4, kind: input, shape index: {}]   ;;  %s1221_s5 = inlined_call_operand.hbm [shape: f32[16,128], index: 5, kind: output, shape index: {}]  }
   0x1   :  { %11 = vsyncpa [#allocation6], 0  ;;  %s30_s20 = sshll.u32 %s1217_s1, 4  ;;  %s31_s20 = int_to_ptr.hbm [resolvable:$true] %s30_s20 }
   0x2   :  { %12 = vsyncpa [#allocation4], 0  ;;  %s929_s21 = smov [#allocation5]   ;;  %s17_s25 = sshll.u32 %s1216_s0, 4  ;;  %s18_s25 = int_to_ptr.hbm [resolvable:$true] %s17_s25 }
   0x3   :  { %s32_s22 = sshll.u32 %s929_s21, 4  ;;  %s930_s26 = smov 64   ;;  %s33_s22 = int_to_ptr.vmem [resolvable:$true] %s32_s22 }
   0x4   :  { %s931_s27 = smov 4   ;;  %s932_s28 = smov [#allocation2]  }
   0x5   :  { %38 = dma.hbm_to_vmem [thread:$0]  %s31_s20, 256, %s33_s22, [#allocation6], %s930_s26, %s930_s26, %s931_s27  }
   0x6   :  { %s19_s29 = sshll.u32 %s932_s28, 4  ;;  %s933_s30 = smov 128   ;;  %s20_s29 = int_to_ptr.vmem [resolvable:$true] %s19_s29 }
   0x7   :  { %s934_s6 = smov 8   ;;  %s45_s8 = sshll.u32 %s1219_s3, 4  ;;  %s46_s8 = int_to_ptr.hbm [resolvable:$true] %s45_s8 }
   0x8   :  { %25 = dma.hbm_to_vmem [thread:$0]  %s18_s25, 8192, %s20_s29, [#allocation3], %s933_s30, %s933_s30, %s934_s6  }
   0x9   :  { %s935_s9 = smov [#allocation7]  }
   0xa   :  { %s47_s0 = sshll.u32 %s935_s9, 4  ;;  %s48_s0 = int_to_ptr.vmem [resolvable:$true] %s47_s0 }
   0xb   :  { %53 = dma.hbm_to_vmem [thread:$0]  %s46_s8, 256, %s48_s0, [#allocation6], %s930_s26, %s930_s26, %s931_s27  }
   0xc   :  { %923 = dma.done.wait [#allocation3], 8192  }
   0xd   :  { %924 = vsyncadd [#allocation3], 4294959104 }
   0xe   :  { %925 = dma.done.wait [#allocation6], 512  }
   0xf   :  { %926 = vsyncadd [#allocation6], 4294966784  ;;  %vm133_vm0 = vcmask 523264   ;;  %v101_v0 = vld [vmem:[#allocation2 + $0x100] sm:$0xff]  ;;  %v102_v6 = vld [vmem:[#allocation2 + $0x108] sm:$0xff]  ;;  %vm531_vm1 = vcmask 130112  }
  0x10   :  { %v73_v1 = vld [vmem:[#allocation2 + $0x20] sm:$0xff]  ;;  %v230_v3 = vsel %vm133_vm0, %v101_v0, 0.0  ;;  %v74_v7 = vld [vmem:[#allocation2 + $0x28] sm:$0xff]  ;;  %v233_v9 = vsel %vm133_vm0, %v102_v6, 0.0  ;;  %v71_v13 = vld [vmem:[#allocation2 + $0x10] sm:$0xff]  ;;  %vm535_vm2 = vcmask 195712  }
  0x11   :  { %v69_v2 = vld [vmem:[#allocation2] sm:$0xff]  ;;  %v146_v4 = vsel %vm133_vm0, %v73_v1, 0.0  ;;  %231 = vadd.xlane.f32.xlu2 %v230_v3  ;;  %v70_v8 = vld [vmem:[#allocation2 + $0x8] sm:$0xff]  ;;  %v149_v10 = vsel %vm133_vm0, %v74_v7, 0.0  ;;  %v140_v16 = vsel %vm133_vm0, %v71_v13, 0.0  ;;  %v75_v18 = vld [vmem:[#allocation2 + $0x30] sm:$0xff] }
  0x12   :  { %v134_v5 = vsel %vm133_vm0, %v69_v2, 0.0  ;;  %147 = vadd.xlane.f32.xlu1 %v146_v4  ;;  %v137_v11 = vsel %vm133_vm0, %v70_v8, 0.0  ;;  %v106_v12 = vld [vmem:[#allocation2 + $0x128] sm:$0xff]  ;;  %v105_v14 = vld [vmem:[#allocation2 + $0x120] sm:$0xff]  ;;  %v76_v19 = vld [vmem:[#allocation2 + $0x38] sm:$0xff]  ;;  %v152_v21 = vsel %vm133_vm0, %v75_v18, 0.0 }
  0x13   :  { %135 = vadd.xlane.f32.xlu0 %v134_v5  ;;  %v245_v15 = vsel %vm133_vm0, %v106_v12, 0.0  ;;  %v242_v17 = vsel %vm133_vm0, %v105_v14, 0.0  ;;  %v72_v20 = vld [vmem:[#allocation2 + $0x18] sm:$0xff]  ;;  %v155_v22 = vsel %vm133_vm0, %v76_v19, 0.0  ;;  %v78_v24 = vld [vmem:[#allocation2 + $0x48] sm:$0xff]  ;;  %v103_v25 = vld [vmem:[#allocation2 + $0x110] sm:$0xff] }
  0x14   :  { %v143_v23 = vsel %vm133_vm0, %v72_v20, 0.0  ;;  %v77_v26 = vld [vmem:[#allocation2 + $0x40] sm:$0xff]  ;;  %v161_v27 = vsel %vm133_vm0, %v78_v24, 0.0  ;;  %v236_v28 = vsel %vm133_vm0, %v103_v25, 0.0  ;;  %v107_v30 = vld [vmem:[#allocation2 + $0x130] sm:$0xff]  ;;  %v108_v31 = vld [vmem:[#allocation2 + $0x138] sm:$0xff] }
  0x15   :  { %v158_v29 = vsel %vm133_vm0, %v77_v26, 0.0  ;;  %v104_v32 = vld [vmem:[#allocation2 + $0x118] sm:$0xff]  ;;  %v248_v33 = vsel %vm133_vm0, %v107_v30, 0.0  ;;  %v251_v34 = vsel %vm133_vm0, %v108_v31, 0.0  ;;  %v110_v36 = vld [vmem:[#allocation2 + $0x148] sm:$0xff]  ;;  %v79_v37 = vld [vmem:[#allocation2 + $0x50] sm:$0xff] }
  0x16   :  { %v239_v35 = vsel %vm133_vm0, %v104_v32, 0.0  ;;  %v109_v38 = vld [vmem:[#allocation2 + $0x140] sm:$0xff]  ;;  %v257_v39 = vsel %vm133_vm0, %v110_v36, 0.0  ;;  %v164_v40 = vsel %vm133_vm0, %v79_v37, 0.0  ;;  %v82_v43 = vld [vmem:[#allocation2 + $0x68] sm:$0xff]  ;;  %v80_v44 = vld [vmem:[#allocation2 + $0x58] sm:$0xff] }
  0x17   :  { %v254_v41 = vsel %vm133_vm0, %v109_v38, 0.0  ;;  %v81_v42 = vld [vmem:[#allocation2 + $0x60] sm:$0xff]  ;;  %v173_v46 = vsel %vm133_vm0, %v82_v43, 0.0  ;;  %v167_v47 = vsel %vm133_vm0, %v80_v44, 0.0  ;;  %v112_v48 = vld [vmem:[#allocation2 + $0x158] sm:$0xff]  ;;  %v111_v50 = vld [vmem:[#allocation2 + $0x150] sm:$0xff] }
  0x18   :  { %v170_v45 = vsel %vm133_vm0, %v81_v42, 0.0  ;;  %v113_v49 = vld [vmem:[#allocation2 + $0x160] sm:$0xff]  ;;  %v263_v51 = vsel %vm133_vm0, %v112_v48, 0.0  ;;  %v260_v53 = vsel %vm133_vm0, %v111_v50, 0.0  ;;  %v83_v54 = vld [vmem:[#allocation2 + $0x70] sm:$0xff]  ;;  %v84_v55 = vld [vmem:[#allocation2 + $0x78] sm:$0xff] }
  0x19   :  { %234 = vadd.xlane.f32.xlu2 %v233_v9  ;;  %v266_v52 = vsel %vm133_vm0, %v113_v49, 0.0  ;;  %v114_v56 = vld [vmem:[#allocation2 + $0x168] sm:$0xff]  ;;  %v176_v57 = vsel %vm133_vm0, %v83_v54, 0.0  ;;  %v179_v58 = vsel %vm133_vm0, %v84_v55, 0.0  ;;  %v115_v61 = vld [vmem:[#allocation2 + $0x170] sm:$0xff]  ;;  %v85_v62 = vld [vmem:[#allocation2 + $0x80] sm:$0xff]  ;;  %v526_v55 = vlaneseq }
  0x1a   :  { %150 = vadd.xlane.f32.xlu1 %v149_v10  ;;  %v269_v59 = vsel %vm133_vm0, %v114_v56, 0.0  ;;  %v86_v60 = vld [vmem:[#allocation2 + $0x88] sm:$0xff]  ;;  %v272_v0 = vsel %vm133_vm0, %v115_v61, 0.0  ;;  %v182_v1 = vsel %vm133_vm0, %v85_v62, 0.0  ;;  %v117_v2 = vld [vmem:[#allocation2 + $0x180] sm:$0xff]  ;;  %v116_v4 = vld [vmem:[#allocation2 + $0x178] sm:$0xff] }
  0x1b   :  { %138 = vadd.xlane.f32.xlu0 %v137_v11  ;;  %v185_v63 = vsel %vm133_vm0, %v86_v60, 0.0  ;;  %v118_v3 = vld [vmem:[#allocation2 + $0x188] sm:$0xff]  ;;  %v278_v5 = vsel %vm133_vm0, %v117_v2, 0.0  ;;  %v275_v7 = vsel %vm133_vm0, %v116_v4, 0.0  ;;  %v88_v8 = vld [vmem:[#allocation2 + $0x98] sm:$0xff]  ;;  %v89_v9 = vld [vmem:[#allocation2 + $0xa0] sm:$0xff] }
  0x1c   :  { %v281_v6 = vsel %vm133_vm0, %v118_v3, 0.0  ;;  %v87_v10 = vld [vmem:[#allocation2 + $0x90] sm:$0xff]  ;;  %v191_v11 = vsel %vm133_vm0, %v88_v8, 0.0  ;;  %v194_v12 = vsel %vm133_vm0, %v89_v9, 0.0  ;;  %v122_v20 = vld [vmem:[#allocation2 + $0x1a8] sm:$0xff]  ;;  %v93_v26 = vld [vmem:[#allocation2 + $0xc0] sm:$0xff] }
  0x1d   :  { %v188_v13 = vsel %vm133_vm0, %v87_v10, 0.0  ;;  %v119_v14 = vld [vmem:[#allocation2 + $0x190] sm:$0xff]  ;;  %v92_v30 = vld [vmem:[#allocation2 + $0xb8] sm:$0xff]  ;;  %v206_v32 = vsel %vm133_vm0, %v93_v26, 0.0  ;;  %v125_v38 = vld [vmem:[#allocation2 + $0x1c0] sm:$0xff]  ;;  %vm539_vm3 = vcmask 261312  }
  0x1e   :  { %v124_v37 = vld [vmem:[#allocation2 + $0x1b8] sm:$0xff]  ;;  %v302_v48 = vsel %vm133_vm0, %v125_v38, 0.0  ;;  %v98_v3 = vld [vmem:[#allocation2 + $0xe8] sm:$0xff]  ;;  %v127_v4 = vld [vmem:[#allocation2 + $0x1d0] sm:$0xff]  ;;  %vm646_vm4 = vcmask 1041409   ;;  %vm648_vm5 = vcmask 1042434  }
  0x1f   :  { %v96_v54 = vld [vmem:[#allocation2 + $0xd8] sm:$0xff]  ;;  %vm650_vm6 = vcmask 1043459   ;;  %vm652_vm7 = vcmask 1044484   ;;  %vm654_vm8 = vcmask 1045509   ;;  %vm656_vm9 = vcmask 1046534   ;;  %s773_s15 = sshll.u32 %s1221_s5, 4  ;;  %s774_s15 = int_to_ptr.hbm [resolvable:$true] %s773_s15 }
  0x20   :  { %vm658_vm10 = vcmask 1047559   ;;  %vm680_vm11 = vcmask 261120  }
  0x21   :  { %141 = vadd.xlane.f32.xlu2 %v140_v16  ;;  %v90_v16 = vld [vmem:[#allocation2 + $0xa8] sm:$0xff] }
  0x22   :  { %246 = vadd.xlane.f32.xlu1 %v245_v15  ;;  %v120_v15 = vld [vmem:[#allocation2 + $0x198] sm:$0xff]  ;;  %v197_v19 = vsel %vm133_vm0, %v90_v16, 0.0 }
  0x23   :  { %243 = vadd.xlane.f32.xlu0 %v242_v17  ;;  %v284_v17 = vsel %vm133_vm0, %v119_v14, 0.0  ;;  %v287_v18 = vsel %vm133_vm0, %v120_v15, 0.0 }
  0x29   :  { %156 = vadd.xlane.f32.xlu2 %v155_v22  ;;  %v121_v22 = vld [vmem:[#allocation2 + $0x1a0] sm:$0xff] }
  0x2a   :  { %153 = vadd.xlane.f32.xlu1 %v152_v21  ;;  %v91_v21 = vld [vmem:[#allocation2 + $0xb0] sm:$0xff]  ;;  %v290_v25 = vsel %vm133_vm0, %v121_v22, 0.0 }
  0x2b   :  { %144 = vadd.xlane.f32.xlu0 %v143_v23  ;;  %v293_v23 = vsel %vm133_vm0, %v122_v20, 0.0  ;;  %v200_v24 = vsel %vm133_vm0, %v91_v21, 0.0 }
  0x31   :  { %237 = vadd.xlane.f32.xlu2 %v236_v28 }
  0x32   :  { %162 = vadd.xlane.f32.xlu1 %v161_v27  ;;  %v94_v27 = vld [vmem:[#allocation2 + $0xc8] sm:$0xff] }
  0x33   :  { %159 = vadd.xlane.f32.xlu0 %v158_v29 }
  0x39   :  { %252 = vadd.xlane.f32.xlu2 %v251_v34  ;;  %v203_v34 = vsel %vm133_vm0, %v92_v30, 0.0 }
  0x3a   :  { %249 = vadd.xlane.f32.xlu1 %v248_v33  ;;  %v209_v33 = vsel %vm133_vm0, %v94_v27, 0.0 }
  0x3b   :  { %240 = vadd.xlane.f32.xlu0 %v239_v35 }
  0x41   :  { %165 = vadd.xlane.f32.xlu2 %v164_v40 }
  0x42   :  { %258 = vadd.xlane.f32.xlu1 %v257_v39 }
  0x43   :  { %255 = vadd.xlane.f32.xlu0 %v254_v41  ;;  %v123_v41 = vld [vmem:[#allocation2 + $0x1b0] sm:$0xff] }
  0x49   :  { %174 = vadd.xlane.f32.xlu2 %v173_v46 }
  0x4a   :  { %171 = vadd.xlane.f32.xlu1 %v170_v45 }
  0x4b   :  { %168 = vadd.xlane.f32.xlu0 %v167_v47  ;;  %v299_v47 = vsel %vm133_vm0, %v124_v37, 0.0 }
  0x51   :  { %267 = vadd.xlane.f32.xlu2 %v266_v52 }
  0x52   :  { %264 = vadd.xlane.f32.xlu1 %v263_v51  ;;  %v296_v51 = vsel %vm133_vm0, %v123_v41, 0.0 }
  0x53   :  { %261 = vadd.xlane.f32.xlu0 %v260_v53  ;;  %v95_v53 = vld [vmem:[#allocation2 + $0xd0] sm:$0xff] }
  0x54   :  { %v212_v62 = vsel %vm133_vm0, %v95_v53, 0.0 }
  0x59   :  { %180 = vadd.xlane.f32.xlu2 %v179_v58  ;;  %v126_v58 = vld [vmem:[#allocation2 + $0x1c8] sm:$0xff] }
  0x5a   :  { %177 = vadd.xlane.f32.xlu1 %v176_v57 }
  0x5b   :  { %270 = vadd.xlane.f32.xlu0 %v269_v59 }
  0x61   :  { %273 = vadd.xlane.f32.xlu2 %v272_v0  ;;  %v305_v0 = vsel %vm133_vm0, %v126_v58, 0.0  ;;  %v131_v58 = vld [vmem:[#allocation2 + $0x1f0] sm:$0xff] }
  0x62   :  { %186 = vadd.xlane.f32.xlu1 %v185_v63  ;;  %v215_v63 = vsel %vm133_vm0, %v96_v54, 0.0 }
  0x63   :  { %183 = vadd.xlane.f32.xlu0 %v182_v1  ;;  %v1035_v1 = vand.u32 127, %v526_v55 }
  0x65   :  { %v1045_v20 = vadd.s32 4294967280, %v1035_v1  ;;  %v1048_v21 = vadd.s32 4294967272, %v1035_v1  ;;  %vm738_vm12 = vcmp.lt.s32.totalorder %v1035_v1, 4 }
  0x69   :  { %282 = vadd.xlane.f32.xlu2 %v281_v6 }
  0x6a   :  { %279 = vadd.xlane.f32.xlu1 %v278_v5  ;;  %v1040_v5 = vadd.s32 4294967288, %v1035_v1 }
  0x6b   :  { %276 = vadd.xlane.f32.xlu0 %v275_v7 }
  0x71   :  { %195 = vadd.xlane.f32.xlu2 %v194_v12 }
  0x72   :  { %192 = vadd.xlane.f32.xlu1 %v191_v11  ;;  %v97_v11 = vld [vmem:[#allocation2 + $0xe0] sm:$0xff] }
  0x73   :  { %189 = vadd.xlane.f32.xlu0 %v188_v13 }
  0x79   :  { %288 = vadd.xlane.f32.xlu2 %v287_v18  ;;  %v221_v18 = vsel %vm133_vm0, %v98_v3, 0.0 }
  0x7a   :  { %285 = vadd.xlane.f32.xlu1 %v284_v17 }
  0x7b   :  { %198 = vadd.xlane.f32.xlu0 %v197_v19  ;;  %v308_v19 = vsel %vm133_vm0, %v127_v4, 0.0 }
  0x81   :  { %201 = vadd.xlane.f32.xlu2 %v200_v24 }
  0x82   :  { %294 = vadd.xlane.f32.xlu1 %v293_v23  ;;  %v218_v23 = vsel %vm133_vm0, %v97_v11, 0.0  ;;  %v320_v11 = vsel %vm133_vm0, %v131_v58, 0.0 }
  0x83   :  { %291 = vadd.xlane.f32.xlu0 %v290_v25 }
  0x84   :  { %v232_v28 = vpop.xlane.xlu2 %231 }
  0x85   :  { %v148_v29 = vpop.xlane.xlu1 %147  ;;  %v358_v35 = vmul.f32 0.015625, %v232_v28 }
  0x86   :  { %v136_v31 = vpop.xlane.xlu0 %135  ;;  %v330_v36 = vmul.f32 0.015625, %v148_v29 }
  0x87   :  { %v326_v45 = vmul.f32 0.015625, %v136_v31 }
  0x89   :  { %210 = vadd.xlane.f32.xlu2 %v209_v33  ;;  %v129_v33 = vld [vmem:[#allocation2 + $0x1e0] sm:$0xff] }
  0x8a   :  { %207 = vadd.xlane.f32.xlu1 %v206_v32 }
  0x8b   :  { %204 = vadd.xlane.f32.xlu0 %v203_v34 }
  0x8c   :  { %v235_v39 = vpop.xlane.xlu2 %234 }
  0x8d   :  { %v151_v40 = vpop.xlane.xlu1 %150  ;;  %v359_v42 = vmul.f32 0.015625, %v235_v39 }
  0x8e   :  { %v331_v43 = vmul.f32 0.015625, %v151_v40  ;;  %v139_v44 = vpop.xlane.xlu0 %138 }
  0x8f   :  { %v327_v46 = vmul.f32 0.015625, %v139_v44  ;;  %v1029_v49 = vpack.c.bf16 %v359_v42, %v358_v35  ;;  %v128_v42 = vld [vmem:[#allocation2 + $0x1d8] sm:$0xff] }
  0x90   :  { %v392_v50 = vpack.c.bf16 %v331_v43, %v330_v36  ;;  %v130_v36 = vld [vmem:[#allocation2 + $0x1e8] sm:$0xff]  ;;  %v311_v54 = vsel %vm133_vm0, %v128_v42, 0.0 }
  0x91   :  { %v390_v52 = vpack.c.bf16 %v327_v46, %v326_v45  ;;  %303 = vadd.xlane.f32.xlu2 %v302_v48  ;;  %v494_v3 = vunpack.c.l.b16 %v1029_v49  ;;  %v495_v4 = vunpack.c.h.b16 %v1029_v49 }
  0x92   :  { %300 = vadd.xlane.f32.xlu1 %v299_v47  ;;  %v466_v6 = vunpack.c.l.b16 %v392_v50  ;;  %v467_v7 = vunpack.c.h.b16 %v392_v50  ;;  %v314_v47 = vsel %vm133_vm0, %v129_v33, 0.0 }
  0x93   :  { %297 = vadd.xlane.f32.xlu0 %v296_v51  ;;  %v462_v12 = vunpack.c.l.b16 %v390_v52  ;;  %v463_v13 = vunpack.c.h.b16 %v390_v52  ;;  %v317_v52 = vsel %vm133_vm0, %v130_v36, 0.0  ;;  %v591_v49 = vperm.slane %v495_v4, %v1040_v5 }
  0x94   :  { %v142_v57 = vpop.xlane.xlu2 %141  ;;  %v541_v24 = vperm.slane %v466_v6, %v1035_v1  ;;  %v542_v25 = vperm.slane %v467_v7, %v1040_v5 }
  0x95   :  { %v247_v56 = vpop.xlane.xlu1 %246  ;;  %v328_v8 = vmul.f32 0.015625, %v142_v57  ;;  %v528_v27 = vperm.slane %v462_v12, %v1035_v1  ;;  %v530_v28 = vperm.slane %v463_v13, %v1040_v5  ;;  %v100_v57 = vld [vmem:[#allocation2 + $0xf8] sm:$0xff] }
  0x96   :  { %v363_v59 = vmul.f32 0.015625, %v247_v56  ;;  %v244_v60 = vpop.xlane.xlu0 %243  ;;  %v543_v37 = vsel %vm531_vm1, %v542_v25, %v541_v24 }
  0x97   :  { %v362_v61 = vmul.f32 0.015625, %v244_v60  ;;  %v532_v43 = vsel %vm531_vm1, %v530_v28, %v528_v27 }
  0x99   :  { %v1037_v2 = vpack.c.bf16 %v363_v59, %v362_v61  ;;  %216 = vadd.xlane.f32.xlu2 %v215_v63 }
  0x9a   :  { %213 = vadd.xlane.f32.xlu1 %v212_v62 }
  0x9b   :  { %306 = vadd.xlane.f32.xlu0 %v305_v0  ;;  %v498_v59 = vunpack.c.l.b16 %v1037_v2  ;;  %v499_v60 = vunpack.c.h.b16 %v1037_v2  ;;  %v99_v0 = vld [vmem:[#allocation2 + $0xf0] sm:$0xff] }
  0x9c   :  { %v157_v10 = vpop.xlane.xlu2 %156  ;;  %v224_v13 = vsel %vm133_vm0, %v99_v0, 0.0 }
  0x9d   :  { %v154_v9 = vpop.xlane.xlu1 %153  ;;  %v333_v15 = vmul.f32 0.015625, %v157_v10  ;;  %v227_v10 = vsel %vm133_vm0, %v100_v57, 0.0  ;;  %v597_v2 = vperm.slane %v498_v59, %v1035_v1 }
  0x9e   :  { %v332_v14 = vmul.f32 0.015625, %v154_v9  ;;  %v145_v16 = vpop.xlane.xlu0 %144 }
  0x9f   :  { %v329_v17 = vmul.f32 0.015625, %v145_v16  ;;  %v590_v16 = vperm.slane %v494_v3, %v1035_v1 }
  0xa0   :  { %v393_v22 = vpack.c.bf16 %v333_v15, %v332_v14  ;;  %v598_v14 = vperm.slane %v499_v60, %v1040_v5 }
  0xa1   :  { %v391_v26 = vpack.c.bf16 %v329_v17, %v328_v8  ;;  %309 = vadd.xlane.f32.xlu2 %v308_v19 }
  0xa2   :  { %v468_v29 = vunpack.c.l.b16 %v393_v22  ;;  %v469_v30 = vunpack.c.h.b16 %v393_v22  ;;  %222 = vadd.xlane.f32.xlu1 %v221_v18  ;;  %v599_v25 = vsel %vm531_vm1, %v598_v14, %v597_v2 }
  0xa3   :  { %v464_v31 = vunpack.c.l.b16 %v391_v26  ;;  %v465_v32 = vunpack.c.h.b16 %v391_v26  ;;  %219 = vadd.xlane.f32.xlu0 %v218_v23 }
  0xa4   :  { %v544_v34 = vperm.slane %v468_v29, %v1045_v20  ;;  %v546_v35 = vperm.slane %v469_v30, %v1048_v21  ;;  %v238_v41 = vpop.xlane.xlu2 %237  ;;  %v132_v30 = vld [vmem:[#allocation2 + $0x1f8] sm:$0xff] }
  0xa5   :  { %v534_v38 = vperm.slane %v464_v31, %v1045_v20  ;;  %v538_v39 = vperm.slane %v465_v32, %v1048_v21  ;;  %v163_v40 = vpop.xlane.xlu1 %162  ;;  %v360_v61 = vmul.f32 0.015625, %v238_v41  ;;  %v592_v31 = vsel %vm531_vm1, %v591_v49, %v590_v16 }
  0xa6   :  { %v545_v44 = vsel %vm535_vm2, %v544_v34, %v543_v37  ;;  %v335_v45 = vmul.f32 0.015625, %v163_v40  ;;  %v160_v46 = vpop.xlane.xlu0 %159 }
  0xa7   :  { %v547_v48 = vsel %vm539_vm3, %v546_v35, %v545_v44  ;;  %v536_v50 = vsel %vm535_vm2, %v534_v38, %v532_v43  ;;  %v334_v51 = vmul.f32 0.015625, %v160_v46 }
  0xa8   :  { %v540_v53 = vsel %vm539_vm3, %v538_v39, %v536_v50  ;;  %v323_v39 = vsel %vm133_vm0, %v132_v30, 0.0 }
  0xa9   :  { %v1069_v55 = vsel %vm646_vm4, %v547_v48, %v540_v53  ;;  %v1071_v56 = vpack.c.bf16 %v335_v45, %v334_v51  ;;  %318 = vadd.xlane.f32.xlu2 %v317_v52 }
  0xaa   :  { %315 = vadd.xlane.f32.xlu1 %v314_v47 }
  0xab   :  { %312 = vadd.xlane.f32.xlu0 %v311_v54  ;;  %v470_v45 = vunpack.c.l.b16 %v1071_v56  ;;  %v471_v46 = vunpack.c.h.b16 %v1071_v56 }
  0xac   :  { %v253_v63 = vpop.xlane.xlu2 %252 }
  0xad   :  { %v250_v62 = vpop.xlane.xlu1 %249  ;;  %v365_v7 = vmul.f32 0.015625, %v253_v63  ;;  %v548_v54 = vperm.slane %v470_v45, %v1035_v1  ;;  %v549_v57 = vperm.slane %v471_v46, %v1040_v5 }
  0xae   :  { %v364_v6 = vmul.f32 0.015625, %v250_v62  ;;  %v241_v8 = vpop.xlane.xlu0 %240 }
  0xaf   :  { %v361_v9 = vmul.f32 0.015625, %v241_v8  ;;  %v550_v56 = vsel %vm531_vm1, %v549_v57, %v548_v54 }
  0xb0   :  { %v409_v12 = vpack.c.bf16 %v365_v7, %v364_v6 }
  0xb1   :  { %v407_v15 = vpack.c.bf16 %v361_v9, %v360_v61  ;;  %321 = vadd.xlane.f32.xlu2 %v320_v11 }
  0xb2   :  { %v500_v17 = vunpack.c.l.b16 %v409_v12  ;;  %v501_v18 = vunpack.c.h.b16 %v409_v12  ;;  %228 = vadd.xlane.f32.xlu1 %v227_v10 }
  0xb3   :  { %v496_v19 = vunpack.c.l.b16 %v407_v15  ;;  %v497_v22 = vunpack.c.h.b16 %v407_v15  ;;  %225 = vadd.xlane.f32.xlu0 %v224_v13 }
  0xb4   :  { %v600_v23 = vperm.slane %v500_v17, %v1045_v20  ;;  %v602_v24 = vperm.slane %v501_v18, %v1048_v21  ;;  %v166_v29 = vpop.xlane.xlu2 %165 }
  0xb5   :  { %v593_v26 = vperm.slane %v496_v19, %v1045_v20  ;;  %v595_v27 = vperm.slane %v497_v22, %v1048_v21  ;;  %v259_v28 = vpop.xlane.xlu1 %258  ;;  %v336_v42 = vmul.f32 0.015625, %v166_v29 }
  0xb6   :  { %v601_v32 = vsel %vm535_vm2, %v600_v23, %v599_v25  ;;  %v367_v33 = vmul.f32 0.015625, %v259_v28  ;;  %v256_v34 = vpop.xlane.xlu0 %255 }
  0xb7   :  { %v603_v35 = vsel %vm539_vm3, %v602_v24, %v601_v32  ;;  %v594_v36 = vsel %vm535_vm2, %v593_v26, %v592_v31  ;;  %v366_v37 = vmul.f32 0.015625, %v256_v34 }
  0xb8   :  { %v596_v38 = vsel %vm539_vm3, %v595_v27, %v594_v36 }
  0xb9   :  { %v660_v40 = vsel %vm646_vm4, %v603_v35, %v596_v38  ;;  %v410_v41 = vpack.c.bf16 %v367_v33, %v366_v37 }
  0xbb   :  { %324 = vadd.xlane.f32.xlu0 %v323_v39  ;;  %v502_v0 = vunpack.c.l.b16 %v410_v41  ;;  %v503_v3 = vunpack.c.h.b16 %v410_v41 }
  0xbc   :  { %v175_v44 = vpop.xlane.xlu2 %174 }
  0xbd   :  { %v172_v43 = vpop.xlane.xlu1 %171  ;;  %v339_v48 = vmul.f32 0.015625, %v175_v44  ;;  %v604_v12 = vperm.slane %v502_v0, %v1035_v1  ;;  %v605_v13 = vperm.slane %v503_v3, %v1040_v5 }
  0xbe   :  { %v338_v47 = vmul.f32 0.015625, %v172_v43  ;;  %v169_v50 = vpop.xlane.xlu0 %168 }
  0xbf   :  { %v337_v51 = vmul.f32 0.015625, %v169_v50  ;;  %v606_v23 = vsel %vm531_vm1, %v605_v13, %v604_v12 }
  0xc0   :  { %v396_v52 = vpack.c.bf16 %v339_v48, %v338_v47 }
  0xc1   :  { %v395_v53 = vpack.c.bf16 %v337_v51, %v336_v42 }
  0xc2   :  { %v474_v15 = vunpack.c.l.b16 %v396_v52  ;;  %v475_v16 = vunpack.c.h.b16 %v396_v52 }
  0xc3   :  { %v472_v58 = vunpack.c.l.b16 %v395_v53  ;;  %v473_v59 = vunpack.c.h.b16 %v395_v53 }
  0xc4   :  { %v268_v63 = vpop.xlane.xlu2 %267  ;;  %v555_v30 = vperm.slane %v474_v15, %v1035_v1  ;;  %v556_v31 = vperm.slane %v475_v16, %v1040_v5 }
  0xc5   :  { %v551_v60 = vperm.slane %v472_v58, %v1045_v20  ;;  %v553_v61 = vperm.slane %v473_v59, %v1048_v21  ;;  %v265_v62 = vpop.xlane.xlu1 %264  ;;  %v370_v49 = vmul.f32 0.015625, %v268_v63 }
  0xc6   :  { %v369_v4 = vmul.f32 0.015625, %v265_v62  ;;  %v262_v6 = vpop.xlane.xlu0 %261  ;;  %v557_v38 = vsel %vm531_vm1, %v556_v31, %v555_v30 }
  0xc7   :  { %v552_v7 = vsel %vm535_vm2, %v551_v60, %v550_v56  ;;  %v368_v8 = vmul.f32 0.015625, %v262_v6 }
  0xc8   :  { %v554_v9 = vsel %vm539_vm3, %v553_v61, %v552_v7 }
  0xc9   :  { %v649_v10 = vsel %vm648_vm5, %v554_v9, %v1069_v55  ;;  %v411_v11 = vpack.c.bf16 %v369_v4, %v368_v8 }
  0xcb   :  { %v504_v2 = vunpack.c.l.b16 %v411_v11  ;;  %v505_v14 = vunpack.c.h.b16 %v411_v11 }
  0xcc   :  { %v181_v22 = vpop.xlane.xlu2 %180 }
  0xcd   :  { %v607_v17 = vperm.slane %v504_v2, %v1045_v20  ;;  %v609_v18 = vperm.slane %v505_v14, %v1048_v21  ;;  %v178_v19 = vpop.xlane.xlu1 %177  ;;  %v341_v55 = vmul.f32 0.015625, %v181_v22 }
  0xce   :  { %v340_v24 = vmul.f32 0.015625, %v178_v19  ;;  %v271_v25 = vpop.xlane.xlu0 %270 }
  0xcf   :  { %v608_v26 = vsel %vm535_vm2, %v607_v17, %v606_v23  ;;  %v371_v27 = vmul.f32 0.015625, %v271_v25 }
  0xd0   :  { %v610_v28 = vsel %vm539_vm3, %v609_v18, %v608_v26  ;;  %v397_v29 = vpack.c.bf16 %v341_v55, %v340_v24 }
  0xd1   :  { %v661_v32 = vsel %vm648_vm5, %v610_v28, %v660_v40  ;;  %v412_v33 = vpack.c.bf16 %v371_v27, %v370_v49 }
  0xd2   :  { %v476_v34 = vunpack.c.l.b16 %v397_v29  ;;  %v477_v35 = vunpack.c.h.b16 %v397_v29 }
  0xd3   :  { %v506_v52 = vunpack.c.l.b16 %v412_v33  ;;  %v507_v53 = vunpack.c.h.b16 %v412_v33 }
  0xd4   :  { %v558_v36 = vperm.slane %v476_v34, %v1045_v20  ;;  %v560_v37 = vperm.slane %v477_v35, %v1048_v21  ;;  %v274_v41 = vpop.xlane.xlu2 %273 }
  0xd5   :  { %v187_v39 = vpop.xlane.xlu1 %186  ;;  %v372_v48 = vmul.f32 0.015625, %v274_v41  ;;  %v611_v62 = vperm.slane %v506_v52, %v1035_v1  ;;  %v612_v63 = vperm.slane %v507_v53, %v1040_v5 }
  0xd6   :  { %v559_v42 = vsel %vm535_vm2, %v558_v36, %v557_v38  ;;  %v343_v43 = vmul.f32 0.015625, %v187_v39  ;;  %v184_v44 = vpop.xlane.xlu0 %183 }
  0xd7   :  { %v561_v45 = vsel %vm539_vm3, %v560_v37, %v559_v42  ;;  %v342_v46 = vmul.f32 0.015625, %v184_v44  ;;  %v613_v8 = vsel %vm531_vm1, %v612_v63, %v611_v62  ;;  %v805_v62 = vld [vmem:[#allocation5] sm:$0xff] }
  0xd8   :  { %v651_v40 = vsel %vm650_vm6, %v561_v45, %v649_v10 }
  0xd9   :  { %v398_v47 = vpack.c.bf16 %v343_v43, %v342_v46 }
  0xdb   :  { %v478_v9 = vunpack.c.l.b16 %v398_v47  ;;  %v479_v10 = vunpack.c.h.b16 %v398_v47 }
  0xdc   :  { %v283_v51 = vpop.xlane.xlu2 %282 }
  0xdd   :  { %v280_v50 = vpop.xlane.xlu1 %279  ;;  %v375_v57 = vmul.f32 0.015625, %v283_v51  ;;  %v562_v49 = vperm.slane %v478_v9, %v1035_v1  ;;  %v563_v17 = vperm.slane %v479_v10, %v1040_v5 }
  0xde   :  { %v374_v54 = vmul.f32 0.015625, %v280_v50  ;;  %v277_v58 = vpop.xlane.xlu0 %276 }
  0xdf   :  { %v373_v59 = vmul.f32 0.015625, %v277_v58  ;;  %v564_v27 = vsel %vm531_vm1, %v563_v17, %v562_v49 }
  0xe0   :  { %v414_v60 = vpack.c.bf16 %v375_v57, %v374_v54 }
  0xe1   :  { %v413_v61 = vpack.c.bf16 %v373_v59, %v372_v48 }
  0xe2   :  { %v510_v22 = vunpack.c.l.b16 %v414_v60  ;;  %v511_v23 = vunpack.c.h.b16 %v414_v60  ;;  %v806_v60 = vld [vmem:[#allocation5 + $0x8] sm:$0xff] }
  0xe3   :  { %v508_v56 = vunpack.c.l.b16 %v413_v61  ;;  %v509_v0 = vunpack.c.h.b16 %v413_v61  ;;  %690 = vmatpush.bf16.msra.mxu0 %v806_v60 }
  0xe4   :  { %v196_v7 = vpop.xlane.xlu2 %195  ;;  %v618_v34 = vperm.slane %v510_v22, %v1035_v1  ;;  %v619_v35 = vperm.slane %v511_v23, %v1040_v5 }
  0xe5   :  { %v614_v3 = vperm.slane %v508_v56, %v1045_v20  ;;  %v616_v4 = vperm.slane %v509_v0, %v1048_v21  ;;  %v193_v6 = vpop.xlane.xlu1 %192  ;;  %v346_v63 = vmul.f32 0.015625, %v196_v7 }
  0xe6   :  { %v345_v11 = vmul.f32 0.015625, %v193_v6  ;;  %v190_v12 = vpop.xlane.xlu0 %189  ;;  %v620_v42 = vsel %vm531_vm1, %v619_v35, %v618_v34 }
  0xe7   :  { %v615_v13 = vsel %vm535_vm2, %v614_v3, %v613_v8  ;;  %v344_v2 = vmul.f32 0.015625, %v190_v12  ;;  %691 = vmatpush.bf16.msra.mxu0 %v805_v62 }
  0xe8   :  { %v617_v14 = vsel %vm539_vm3, %v616_v4, %v615_v13 }
  0xe9   :  { %v662_v15 = vsel %vm650_vm6, %v617_v14, %v661_v32  ;;  %v399_v16 = vpack.c.bf16 %v345_v11, %v344_v2 }
  0xeb   :  { %v480_v18 = vunpack.c.l.b16 %v399_v16  ;;  %v481_v19 = vunpack.c.h.b16 %v399_v16 }
  0xec   :  { %v289_v26 = vpop.xlane.xlu2 %288 }
  0xed   :  { %v565_v24 = vperm.slane %v480_v18, %v1045_v20  ;;  %v567_v55 = vperm.slane %v481_v19, %v1048_v21  ;;  %v286_v25 = vpop.xlane.xlu1 %285  ;;  %v377_v29 = vmul.f32 0.015625, %v289_v26 }
  0xee   :  { %v376_v28 = vmul.f32 0.015625, %v286_v25  ;;  %v199_v30 = vpop.xlane.xlu0 %198 }
  0xef   :  { %v566_v31 = vsel %vm535_vm2, %v565_v24, %v564_v27  ;;  %v347_v56 = vmul.f32 0.015625, %v199_v30 }
  0xf0   :  { %v568_v32 = vsel %vm539_vm3, %v567_v55, %v566_v31  ;;  %v415_v33 = vpack.c.bf16 %v377_v29, %v376_v28 }
  0xf1   :  { %v1141_v36 = vsel %vm652_vm7, %v568_v32, %v651_v40  ;;  %v400_v8 = vpack.c.bf16 %v347_v56, %v346_v63 }
  0xf2   :  { %v512_v37 = vunpack.c.l.b16 %v415_v33  ;;  %v513_v38 = vunpack.c.h.b16 %v415_v33 }
  0xf3   :  { %v482_v14 = vunpack.c.l.b16 %v400_v8 }
  0xf4   :  { %v621_v39 = vperm.slane %v512_v37, %v1045_v20  ;;  %v623_v41 = vperm.slane %v513_v38, %v1048_v21  ;;  %v202_v44 = vpop.xlane.xlu2 %201 }
  0xf5   :  { %v295_v43 = vpop.xlane.xlu1 %294  ;;  %v348_v10 = vmul.f32 0.015625, %v202_v44  ;;  %v569_v31 = vperm.slane %v482_v14, %v1035_v1 }
  0xf6   :  { %v622_v45 = vsel %vm535_vm2, %v621_v39, %v620_v42  ;;  %v292_v46 = vpop.xlane.xlu0 %291  ;;  %v379_v4 = vmul.f32 0.015625, %v295_v43 }
  0xf7   :  { %v624_v47 = vsel %vm539_vm3, %v623_v41, %v622_v45  ;;  %v378_v6 = vmul.f32 0.015625, %v292_v46 }
  0xf8   :  { %v1149_v48 = vsel %vm652_vm7, %v624_v47, %v662_v15  ;;  %v483_v15 = vunpack.c.h.b16 %v400_v8 }
  0xf9   :  { %v416_v9 = vpack.c.bf16 %v379_v4, %v378_v6 }
  0xfa   :  { %v570_v32 = vperm.slane %v483_v15, %v1040_v5 }
  0xfb   :  { %v514_v49 = vunpack.c.l.b16 %v416_v9  ;;  %v515_v17 = vunpack.c.h.b16 %v416_v9 }
  0xfc   :  { %v211_v50 = vpop.xlane.xlu2 %210 }
  0xfd   :  { %v208_v40 = vpop.xlane.xlu1 %207  ;;  %v351_v12 = vmul.f32 0.015625, %v211_v50  ;;  %v625_v34 = vperm.slane %v514_v49, %v1035_v1  ;;  %v626_v35 = vperm.slane %v515_v17, %v1040_v5 }
  0xfe   :  { %v205_v51 = vpop.xlane.xlu0 %204  ;;  %v350_v11 = vmul.f32 0.015625, %v208_v40 }
  0xff   :  { %v349_v13 = vmul.f32 0.015625, %v205_v51  ;;  %v571_v51 = vsel %vm531_vm1, %v570_v32, %v569_v31 }
 0x100   :  { %v402_v25 = vpack.c.bf16 %v351_v12, %v350_v11 }
 0x101   :  { %v401_v26 = vpack.c.bf16 %v349_v13, %v348_v10 }
 0x102   :  { %v486_v39 = vunpack.c.l.b16 %v402_v25  ;;  %v487_v41 = vunpack.c.h.b16 %v402_v25 }
 0x103   :  { %v484_v42 = vunpack.c.l.b16 %v401_v26 }
 0x104   :  { %v304_v53 = vpop.xlane.xlu2 %303 }
 0x105   :  { %v301_v52 = vpop.xlane.xlu1 %300  ;;  %v382_v19 = vmul.f32 0.015625, %v304_v53 }
 0x106   :  { %v298_v54 = vpop.xlane.xlu0 %297  ;;  %v381_v18 = vmul.f32 0.015625, %v301_v52  ;;  %v485_v52 = vunpack.c.h.b16 %v401_v26 }
 0x107   :  { %v380_v7 = vmul.f32 0.015625, %v298_v54 }
 0x108   :  { %v574_v9 = vperm.slane %v485_v52, %v1048_v21 }
 0x109   :  { %v417_v33 = vpack.c.bf16 %v381_v18, %v380_v7 }
 0x10b   :  { %v516_v53 = vunpack.c.l.b16 %v417_v33  ;;  %v517_v10 = vunpack.c.h.b16 %v417_v33 }
 0x10c   :  { %v217_v58 = vpop.xlane.xlu2 %216 }
 0x10d   :  { %v214_v57 = vpop.xlane.xlu1 %213  ;;  %v353_v23 = vmul.f32 0.015625, %v217_v58  ;;  %v628_v11 = vperm.slane %v516_v53, %v1045_v20 }
 0x10e   :  { %v307_v59 = vpop.xlane.xlu0 %306  ;;  %v352_v22 = vmul.f32 0.015625, %v214_v57  ;;  %v627_v57 = vsel %vm531_vm1, %v626_v35, %v625_v34 }
 0x10f   :  { %v383_v24 = vmul.f32 0.015625, %v307_v59 }
 0x110   :  { %v403_v37 = vpack.c.bf16 %v353_v23, %v352_v22 }
 0x111   :  { %v418_v38 = vpack.c.bf16 %v383_v24, %v382_v19 }
 0x112   :  { %v488_v58 = vunpack.c.l.b16 %v403_v37  ;;  %v489_v13 = vunpack.c.h.b16 %v403_v37 }
 0x113   :  { %v518_v59 = vunpack.c.l.b16 %v418_v38  ;;  %v519_v60 = vunpack.c.h.b16 %v418_v38 }
 0x114   :  { %v310_v3 = vpop.xlane.xlu2 %309  ;;  %v581_v31 = vperm.slane %v489_v13, %v1048_v21 }
 0x115   :  { %v223_v61 = vpop.xlane.xlu1 %222  ;;  %v384_v29 = vmul.f32 0.015625, %v310_v3  ;;  %v572_v3 = vperm.slane %v484_v42, %v1045_v20  ;;  %v632_v14 = vperm.slane %v518_v59, %v1035_v1  ;;  %v633_v15 = vperm.slane %v519_v60, %v1040_v5 }
 0x116   :  { %v220_v0 = vpop.xlane.xlu0 %219  ;;  %v355_v27 = vmul.f32 0.015625, %v223_v61  ;;  %v576_v61 = vperm.slane %v486_v39, %v1035_v1 }
 0x117   :  { %v354_v28 = vmul.f32 0.015625, %v220_v0  ;;  %v577_v0 = vperm.slane %v487_v41, %v1040_v5  ;;  %v573_v25 = vsel %vm535_vm2, %v572_v3, %v571_v51  ;;  %v634_v32 = vsel %vm531_vm1, %v633_v15, %v632_v14 }
 0x119   :  { %v404_v43 = vpack.c.bf16 %v355_v27, %v354_v28  ;;  %v629_v28 = vsel %vm535_vm2, %v628_v11, %v627_v57 }
 0x11b   :  { %v490_v62 = vunpack.c.l.b16 %v404_v43  ;;  %v491_v63 = vunpack.c.h.b16 %v404_v43 }
 0x11c   :  { %v319_v55 = vpop.xlane.xlu2 %318 }
 0x11d   :  { %v316_v2 = vpop.xlane.xlu1 %315  ;;  %v387_v40 = vmul.f32 0.015625, %v319_v55  ;;  %v584_v49 = vperm.slane %v491_v63, %v1040_v5  ;;  %v578_v55 = vsel %vm531_vm1, %v577_v0, %v576_v61  ;;  %v807_v63 = vld [vmem:[#allocation7] sm:$0xff] }
 0x11e   :  { %v313_v16 = vpop.xlane.xlu0 %312  ;;  %v386_v45 = vmul.f32 0.015625, %v316_v2  ;;  %v579_v2 = vperm.slane %v488_v58, %v1045_v20 }
 0x11f   :  { %v385_v30 = vmul.f32 0.015625, %v313_v16  ;;  %v583_v16 = vperm.slane %v490_v62, %v1035_v1  ;;  %v808_v62 = vld [vmem:[#allocation7 + $0x8] sm:$0xff] }
 0x120   :  { %v420_v6 = vpack.c.bf16 %v387_v40, %v386_v45  ;;  %v575_v45 = vsel %vm539_vm3, %v574_v9, %v573_v25  ;;  %730 = vmatpush.bf16.msra.mxu1 %v808_v62  ;;  %v818_v9 = vld [vmem:[%s1220_s4] ss:$0 sm:$0xff] }
 0x121   :  { %v419_v46 = vpack.c.bf16 %v385_v30, %v384_v29  ;;  %v630_v29 = vperm.slane %v517_v10, %v1048_v21  ;;  %v580_v30 = vsel %vm535_vm2, %v579_v2, %v578_v55  ;;  %v585_v33 = vsel %vm531_vm1, %v584_v49, %v583_v16 }
 0x122   :  { %v522_v19 = vunpack.c.l.b16 %v420_v6  ;;  %v523_v22 = vunpack.c.h.b16 %v420_v6 }
 0x123   :  { %v520_v4 = vunpack.c.l.b16 %v419_v46  ;;  %v521_v17 = vunpack.c.h.b16 %v419_v46  ;;  %v631_v46 = vsel %vm539_vm3, %v630_v29, %v629_v28 }
 0x124   :  { %v322_v8 = vpop.xlane.xlu2 %321  ;;  %v639_v38 = vperm.slane %v522_v19, %v1035_v1  ;;  %v640_v39 = vperm.slane %v523_v22, %v1040_v5  ;;  %v664_v57 = vsel %vm654_vm8, %v631_v46, %v1149_v48  ;;  %731 = vmatpush.bf16.msra.mxu1 %v807_v63 }
 0x125   :  { %v229_v44 = vpop.xlane.xlu1 %228  ;;  %v388_v18 = vmul.f32 0.015625, %v322_v8  ;;  %v635_v7 = vperm.slane %v520_v4, %v1045_v20  ;;  %v637_v34 = vperm.slane %v521_v17, %v1048_v21 }
 0x126   :  { %v357_v47 = vmul.f32 0.015625, %v229_v44  ;;  %v226_v50 = vpop.xlane.xlu0 %225  ;;  %v641_v51 = vsel %vm531_vm1, %v640_v39, %v639_v38 }
 0x127   :  { %v356_v54 = vmul.f32 0.015625, %v226_v50  ;;  %v636_v37 = vsel %vm535_vm2, %v635_v7, %v634_v32  ;;  %v582_v50 = vsel %vm539_vm3, %v581_v31, %v580_v30 }
 0x128   :  { %v638_v5 = vsel %vm539_vm3, %v637_v34, %v636_v37 }
 0x129   :  { %v405_v56 = vpack.c.bf16 %v357_v47, %v356_v54  ;;  %v655_v54 = vsel %vm654_vm8, %v575_v45, %v1141_v36  ;;  %v665_v59 = vsel %vm656_vm9, %v638_v5, %v664_v57  ;;  %v817_v36 = vld [vmem:[%s1218_s2] ss:$0 sm:$0xff]  ;;  %s936_s2 = smov [#allocation8]  }
 0x12a   :  { %s771_s4 = sshll.u32 %s936_s2, 4  ;;  %s772_s4 = int_to_ptr.vmem [resolvable:$true] %s771_s4 }
 0x12b   :  { %v492_v12 = vunpack.c.l.b16 %v405_v56  ;;  %v493_v23 = vunpack.c.h.b16 %v405_v56 }
 0x12d   :  { %v586_v26 = vperm.slane %v492_v12, %v1045_v20  ;;  %v588_v41 = vperm.slane %v493_v23, %v1048_v21 }
 0x12e   :  { %v325_v24 = vpop.xlane.xlu0 %324 }
 0x12f   :  { %v389_v27 = vmul.f32 0.015625, %v325_v24  ;;  %v587_v44 = vsel %vm535_vm2, %v586_v26, %v585_v33 }
 0x130   :  { %v589_v52 = vsel %vm539_vm3, %v588_v41, %v587_v44 }
 0x131   :  { %v421_v35 = vpack.c.bf16 %v389_v27, %v388_v18 }
 0x133   :  { %v524_v42 = vunpack.c.l.b16 %v421_v35  ;;  %v525_v43 = vunpack.c.h.b16 %v421_v35 }
 0x135   :  { %v642_v47 = vperm.slane %v524_v42, %v1045_v20  ;;  %v644_v40 = vperm.slane %v525_v43, %v1048_v21  ;;  %v657_v20 = vsel %vm656_vm9, %v582_v50, %v655_v54 }
 0x136   :  { %v659_v21 = vsel %vm658_vm10, %v589_v52, %v657_v20 }
 0x137   :  { %v643_v53 = vsel %vm535_vm2, %v642_v47, %v641_v51 }
 0x138   :  { %v645_v58 = vsel %vm539_vm3, %v644_v40, %v643_v53 }
 0x139   :  { %v666_v60 = vsel %vm658_vm10, %v645_v58, %v665_v59 }
 0x13a   :  { %v667_v61 = vpack.c.b16 %v666_v60, %v659_v21 }
 0x13c   :  { %795 = vmatmul.msk.bf16.vlgmr.msra.gmra.mxu0 %vm680_vm11, %v667_v61 }
 0x1b9   :  { %v693_v56 = vpop.f32.mrf.mxu0 }
 0x1ba   :  { %v694_v0 = vadd.f32 %v817_v36, %v693_v56 }
 0x1bc   :  { %v698_v4 = vmax.f32 %v694_v0, 0.0 }
 0x1c1   :  { %v695_v48 = vpop.f32.mrf.mxu0 }
 0x1c2   :  { %v696_v3 = vadd.f32 %v817_v36, %v695_v48 }
 0x1c4   :  { %v699_v6 = vmax.f32 %v696_v3, 0.0 }
 0x1c6   :  { %v700_v8 = vpack.c.bf16 %v699_v6, %v698_v4 }
 0x1c8   :  { %804 = vmatmul.msk.bf16.vlgmr.msra.gmra.mxu1 %vm680_vm11, %v700_v8 }
 0x245   :  { %v733_v10 = vpop.f32.mrf.mxu1 }
 0x246   :  { %v734_v11 = vadd.f32 %v818_v9, %v733_v10 }
 0x248   :  { %v739_v12 = vsel %vm738_vm12, %v734_v11, -inf }
 0x249   :  { %741 = vmax.xlane.f32.xlu1 %v739_v12 }
 0x24d   :  { %v735_v13 = vpop.f32.mrf.mxu1 }
 0x24e   :  { %v736_v2 = vadd.f32 %v818_v9, %v735_v13 }
 0x250   :  { %v740_v14 = vsel %vm738_vm12, %v736_v2, -inf }
 0x251   :  { %743 = vmax.xlane.f32.xlu2 %v740_v14 }
 0x2bc   :  { %v742_v15 = vpop.xlane.xlu1 %741 }
 0x2bd   :  { %v745_v16 = vsub.f32 %v739_v12, %v742_v15 }
 0x2bf   :  { %v747_v49 = vmul.f32 1.442695, %v745_v16 }
 0x2c1   :  { %819 = vpow2.f32 %v747_v49 }
 0x2c4   :  { %v744_v17 = vpop.xlane.xlu2 %743 }
 0x2c5   :  { %v746_v18 = vsub.f32 %v740_v14, %v744_v17 }
 0x2c7   :  { %v820_v7 = vpop.eup %819  ;;  %v749_v19 = vmul.f32 1.442695, %v746_v18 }
 0x2c8   :  { %751 = vadd.xlane.f32.xlu0 %v820_v7 }
 0x2c9   :  { %821 = vpow2.f32 %v749_v19 }
 0x2cf   :  { %v822_v22 = vpop.eup %821 }
 0x2d0   :  { %753 = vadd.xlane.f32.xlu1 %v822_v22 }
 0x33b   :  { %v752_v23 = vpop.xlane.xlu0 %751 }
 0x33c   :  { %823 = vlog2.f32 %v752_v23 }
 0x342   :  { %v824_v24 = vpop.eup %823 }
 0x343   :  { %v756_v55 = vmul.f32 0.6931472, %v824_v24  ;;  %v754_v25 = vpop.xlane.xlu1 %753 }
 0x344   :  { %825 = vlog2.f32 %v754_v25 }
 0x345   :  { %v759_v26 = vadd.f32 %v756_v55, %v742_v15 }
 0x347   :  { %v761_v27 = vsub.f32 %v734_v11, %v759_v26 }
 0x349   :  { %v763_v28 = vsel %vm738_vm12, %v761_v27, %v734_v11 }
 0x34a   :  { %v826_v29 = vpop.eup %825  ;;  %765 = vst [vmem:[#allocation8] sm:$0xff] %v763_v28 }
 0x34b   :  { %v758_v30 = vmul.f32 0.6931472, %v826_v29 }
 0x34d   :  { %v760_v31 = vadd.f32 %v758_v30, %v744_v17 }
 0x34f   :  { %v762_v32 = vsub.f32 %v736_v2, %v760_v31 }
 0x351   :  { %v764_v33 = vsel %vm738_vm12, %v762_v32, %v736_v2 }
 0x352   :  { %766 = vst [vmem:[#allocation8 + $0x8] sm:$0xff] %v764_v33 }
 0x353   :  { %779 = dma.vmem_to_hbm [thread:$0]  %s772_s4, 256, %s774_s15, [#allocation4], %s933_s30, %s933_s30, %s934_s6  }
 0x354   :  { %927 = dma.done.wait [#allocation4], 256  }
 0x355   :  { %928 = vsyncadd [#allocation4], 4294967040 }
 0x356   :  { %784 = vsyncpa [#allocation3], 1 }
 0x357   :  { %785 = vsyncpa [#allocation6], 1 }
 0x358   :  { %786 = vsyncpa [#allocation4], 1 }

</bundles_post_ra>
